<compile_context>
chip_gen: v5e
topology: v5e:2x2
jax: 0.10.0
libtpu: 0.0.40
codegen_flags: <defaults>
</compile_context>

<pallas_src>
import functools
import math

import jax
import jax.numpy as jnp
from jax.experimental import pallas as pl
from jax.experimental.pallas import tpu as pltpu

BN_EPS = 1e-5
LANE = 128          # channel padding / lane tile
TM = 256            # row tile for matmuls


def _round_up(x, m):
    return ((x + m - 1) // m) * m


def _pick_tile(dim, candidates):
    for c in candidates:
        if dim % c == 0:
            return c
    return dim


def _apply_act(y, act):
    if act == "silu":
        return y * jax.nn.sigmoid(y)
    if act == "sigmoid":
        return jax.nn.sigmoid(y)
    return y


# ----------------------- tiled matmul (convs as GEMM, fc) -------------------

def _mm_kernel(x_ref, w_ref, s_ref, b_ref, o_ref, acc_ref, *, act):
    @pl.when(pl.program_id(2) == 0)
    def _():
        acc_ref[...] = jnp.zeros_like(acc_ref)

    acc_ref[...] += jnp.dot(x_ref[...], w_ref[...],
                            preferred_element_type=jnp.float32)

    @pl.when(pl.program_id(2) == pl.num_programs(2) - 1)
    def _():
        y = acc_ref[...] * s_ref[...] + b_ref[...]
        o_ref[...] = _apply_act(y, act).astype(o_ref.dtype)


def _mm_res_kernel(x_ref, w_ref, s_ref, b_ref, r_ref, o_ref, acc_ref, *, act):
    @pl.when(pl.program_id(2) == 0)
    def _():
        acc_ref[...] = jnp.zeros_like(acc_ref)

    acc_ref[...] += jnp.dot(x_ref[...], w_ref[...],
                            preferred_element_type=jnp.float32)

    @pl.when(pl.program_id(2) == pl.num_programs(2) - 1)
    def _():
        y = acc_ref[...] * s_ref[...] + b_ref[...] + r_ref[...].astype(jnp.float32)
        o_ref[...] = _apply_act(y, act).astype(o_ref.dtype)


def pallas_matmul(x, w, s, b, act="none", residual=None, out_dtype=jnp.bfloat16):
    """(R, K) @ (Kp, Cp) with folded-BN scale/bias + activation (+ residual)."""
    R, K = x.shape
    Kp, Cp = w.shape
    if K < Kp:                                    # pad K (e.g. stem K=27 -> 128)
        x = jnp.pad(x, ((0, 0), (0, Kp - K)))
    x = x.astype(jnp.bfloat16)

    Rp8 = _round_up(R, 8)
    tm = TM if Rp8 >= TM else Rp8
    Rp = _round_up(Rp8, tm)
    if Rp > R:
        x = jnp.pad(x, ((0, Rp - R), (0, 0)))
        if residual is not None:
            residual = jnp.pad(residual, ((0, Rp - R), (0, 0)))
    tk = _pick_tile(Kp, (512, 384, 256, 128))
    tn = _pick_tile(Cp, (256, 128))
    grid = (Rp // tm, Cp // tn, Kp // tk)

    in_specs = [
        pl.BlockSpec((tm, tk), lambda i, j, k: (i, k)),
        pl.BlockSpec((tk, tn), lambda i, j, k: (k, j)),
        pl.BlockSpec((1, tn), lambda i, j, k: (0, j)),
        pl.BlockSpec((1, tn), lambda i, j, k: (0, j)),
    ]
    args = [x, w, s, b]
    if residual is None:
        kernel = functools.partial(_mm_kernel, act=act)
    else:
        kernel = functools.partial(_mm_res_kernel, act=act)
        in_specs.append(pl.BlockSpec((tm, tn), lambda i, j, k: (i, j)))
        args.append(residual.astype(jnp.bfloat16))

    out = pl.pallas_call(
        kernel,
        grid=grid,
        in_specs=in_specs,
        out_specs=pl.BlockSpec((tm, tn), lambda i, j, k: (i, j)),
        out_shape=jax.ShapeDtypeStruct((Rp, Cp), out_dtype),
        scratch_shapes=[pltpu.VMEM((tm, tn), jnp.float32)],
        compiler_params=pltpu.CompilerParams(
            dimension_semantics=("parallel", "parallel", "arbitrary")),
    )(*args)
    return out[:R]


# ------------------- depthwise conv, stride 1: halo kernel ------------------

def _dw_s1_kernel(x_ref, w_ref, s_ref, b_ref, o_ref, *, k, H, W, act):
    acc = None
    for i in range(k):
        for j in range(k):
            tap = x_ref[0, i:i + H, j:j + W, :].astype(jnp.float32)
            tap = tap * w_ref[i * k + j, 0, :]
            acc = tap if acc is None else acc + tap
    y = acc * s_ref[0] + b_ref[0]
    o_ref[0] = _apply_act(y, act).astype(o_ref.dtype)


def depthwise_s1(x, p, k, act="silu"):
    N, H, W, Cp = x.shape
    pad = (k - 1) // 2
    xp = jnp.pad(x, ((0, 0), (pad, pad), (pad, pad), (0, 0)))
    Hp, Wp = H + 2 * pad, W + 2 * pad
    tc = LANE
    return pl.pallas_call(
        functools.partial(_dw_s1_kernel, k=k, H=H, W=W, act=act),
        grid=(N, Cp // tc),
        in_specs=[
            pl.BlockSpec((1, Hp, Wp, tc), lambda n, c: (n, 0, 0, c)),
            pl.BlockSpec((k * k, 1, tc), lambda n, c: (0, 0, c)),
            pl.BlockSpec((1, tc), lambda n, c: (0, c)),
            pl.BlockSpec((1, tc), lambda n, c: (0, c)),
        ],
        out_specs=pl.BlockSpec((1, H, W, tc), lambda n, c: (n, 0, 0, c)),
        out_shape=jax.ShapeDtypeStruct((N, H, W, Cp), jnp.bfloat16),
        compiler_params=pltpu.CompilerParams(
            dimension_semantics=("parallel", "parallel")),
    )(xp, p["w"], p["s"], p["b"])


# --------------- depthwise conv, stride 2: tiled tap kernel -----------------
# TODO(synk): the 4 stride-2 depthwise layers still materialize k*k taps in
# HBM; a halo kernel with strided in-kernel loads would remove that too.

def _dw_taps_kernel(t_ref, w_ref, s_ref, b_ref, o_ref, *, kk, act):
    acc = t_ref[0].astype(jnp.float32) * w_ref[0, 0, :]
    for t in range(1, kk):
        acc = acc + t_ref[t].astype(jnp.float32) * w_ref[t, 0, :]
    y = acc * s_ref[...] + b_ref[...]
    o_ref[...] = _apply_act(y, act).astype(o_ref.dtype)


def _dw_taps(x, k, stride, pad):
    N, H, W, C = x.shape
    xp = jnp.pad(x, ((0, 0), (pad, pad), (pad, pad), (0, 0)))
    Ho = (H + 2 * pad - k) // stride + 1
    Wo = (W + 2 * pad - k) // stride + 1
    taps = []
    for i in range(k):
        for j in range(k):
            taps.append(
                xp[:, i:i + (Ho - 1) * stride + 1:stride,
                      j:j + (Wo - 1) * stride + 1:stride, :])
    taps = jnp.stack(taps, axis=0).reshape(k * k, N * Ho * Wo, C)
    return taps, Ho, Wo


def depthwise_s2(x, p, k, stride, act="silu"):
    N, H, W, Cp = x.shape
    pad = (k - 1) // 2
    taps, Ho, Wo = _dw_taps(x, k, stride, pad)
    kk = k * k
    R = N * Ho * Wo
    Rp8 = _round_up(R, 8)
    tm = TM if Rp8 >= TM else Rp8
    Rp = _round_up(Rp8, tm)
    if Rp > R:
        taps = jnp.pad(taps, ((0, 0), (0, Rp - R), (0, 0)))
    tc = LANE
    out = pl.pallas_call(
        functools.partial(_dw_taps_kernel, kk=kk, act=act),
        grid=(Rp // tm, Cp // tc),
        in_specs=[
            pl.BlockSpec((kk, tm, tc), lambda i, c: (0, i, c)),
            pl.BlockSpec((kk, 1, tc), lambda i, c: (0, 0, c)),
            pl.BlockSpec((1, tc), lambda i, c: (0, c)),
            pl.BlockSpec((1, tc), lambda i, c: (0, c)),
        ],
        out_specs=pl.BlockSpec((tm, tc), lambda i, c: (i, c)),
        out_shape=jax.ShapeDtypeStruct((Rp, Cp), jnp.bfloat16),
        compiler_params=pltpu.CompilerParams(
            dimension_semantics=("parallel", "parallel")),
    )(taps, p["w"], p["s"], p["b"])
    return out[:R].reshape(N, Ho, Wo, Cp)


# -------------------- fused Squeeze-Excitation block ------------------------
# pool -> fc1 + SiLU -> fc2 + sigmoid -> gate multiply, all in one kernel.

def _se_kernel(x_ref, w1_ref, b1_ref, w2_ref, b2_ref, o_ref, *, inv_hw):
    x = x_ref[0]                                                   # (HW, Cp) bf16
    pooled = jnp.sum(x.astype(jnp.float32), axis=0, keepdims=True) * inv_hw
    h = jnp.dot(pooled.astype(jnp.bfloat16), w1_ref[...],
                preferred_element_type=jnp.float32) + b1_ref[...]
    h = h * jax.nn.sigmoid(h)                                      # SiLU
    g = jnp.dot(h.astype(jnp.bfloat16), w2_ref[...],
                preferred_element_type=jnp.float32) + b2_ref[...]
    g = jax.nn.sigmoid(g)                                          # (1, Cp)
    o_ref[0] = (x.astype(jnp.float32) * g).astype(o_ref.dtype)


def se_forward(x, p):
    N, H, W, Cp = x.shape
    HW = H * W
    Csq = p["w1"].shape[1]
    x2 = x.reshape(N, HW, Cp)
    out = pl.pallas_call(
        functools.partial(_se_kernel, inv_hw=1.0 / float(HW)),
        grid=(N,),
        in_specs=[
            pl.BlockSpec((1, HW, Cp), lambda n: (n, 0, 0)),
            pl.BlockSpec((Cp, Csq), lambda n: (0, 0)),
            pl.BlockSpec((1, Csq), lambda n: (0, 0)),
            pl.BlockSpec((Csq, Cp), lambda n: (0, 0)),
            pl.BlockSpec((1, Cp), lambda n: (0, 0)),
        ],
        out_specs=pl.BlockSpec((1, HW, Cp), lambda n: (n, 0, 0)),
        out_shape=jax.ShapeDtypeStruct((N, HW, Cp), jnp.bfloat16),
        compiler_params=pltpu.CompilerParams(dimension_semantics=("parallel",)),
    )(x2, p["w1"], p["b1"], p["w2"], p["b2"])
    return out.reshape(N, H, W, Cp)


# ---------------------------- global average pool ----------------------------
# TODO(synk): could be fused into the head 1x1 conv epilogue; kept as a small
# tiled kernel (channel-tile grid) since the head activation is already small.

def _pool_kernel(x_ref, o_ref, *, inv_hw):
    o_ref[...] = jnp.sum(x_ref[...].astype(jnp.float32), axis=1) * inv_hw


def pallas_avgpool(x):  # (N, HW, Cp) -> (N, Cp) f32
    N, HW, Cp = x.shape
    tc = LANE
    return pl.pallas_call(
        functools.partial(_pool_kernel, inv_hw=1.0 / float(HW)),
        grid=(Cp // tc,),
        in_specs=[pl.BlockSpec((N, HW, tc), lambda c: (0, 0, c))],
        out_specs=pl.BlockSpec((N, tc), lambda c: (0, c)),
        out_shape=jax.ShapeDtypeStruct((N, Cp), jnp.float32),
        compiler_params=pltpu.CompilerParams(dimension_semantics=("parallel",)),
    )(x)


# --------------------------- plain-JAX glue ---------------------------------

def _im2col(x, k, stride, pad):
    # only used for the 3-channel stem (patch order (kh, kw, cin)).
    N, H, W, C = x.shape
    xp = jnp.pad(x, ((0, 0), (pad, pad), (pad, pad), (0, 0)))
    Ho = (H + 2 * pad - k) // stride + 1
    Wo = (W + 2 * pad - k) // stride + 1
    cols = []
    for i in range(k):
        for j in range(k):
            cols.append(
                xp[:, i:i + (Ho - 1) * stride + 1:stride,
                      j:j + (Wo - 1) * stride + 1:stride, :])
    patches = jnp.concatenate(cols, axis=-1)
    return patches.reshape(N * Ho * Wo, k * k * C), Ho, Wo


def conv2d_bn(x, p, k, stride, act):
    N = x.shape[0]
    patches, Ho, Wo = _im2col(x, k, stride, (k - 1) // 2)
    y = pallas_matmul(patches, p["w"], p["s"], p["b"], act)
    return y.reshape(N, Ho, Wo, -1)


def conv1x1_bn(x, p, act, residual=None):
    N, H, W, Cp = x.shape
    r = None if residual is None else residual.reshape(N * H * W, -1)
    y = pallas_matmul(x.reshape(N * H * W, Cp), p["w"], p["s"], p["b"], act,
                      residual=r)
    return y.reshape(N, H, W, -1)


def mbconv_forward(x, p, cfg):
    expand, k, stride, cin, cout = cfg
    inp = x
    h = x
    if expand != 1:
        h = conv1x1_bn(h, p["expand"], act="silu")
    if stride == 1:
        h = depthwise_s1(h, p["dw"], k, act="silu")
    else:
        h = depthwise_s2(h, p["dw"], k, stride, act="silu")
    h = se_forward(h, p["se"])
    if stride == 1 and cin == cout:
        # residual add fused into the project-conv epilogue.
        # TODO(synk): stochastic depth is identity in eval mode; skipped.
        h = conv1x1_bn(h, p["project"], act="none", residual=inp)
    else:
        h = conv1x1_bn(h, p["project"], act="none")
    return h


# --------------------------- config & params --------------------------------

def b1_blocks():
    # torchvision efficientnet_b1: width_mult=1.0, depth_mult=1.1
    base = [
        (1, 3, 1, 32, 16, 1),
        (6, 3, 2, 16, 24, 2),
        (6, 5, 2, 24, 40, 2),
        (6, 3, 2, 40, 80, 3),
        (6, 5, 1, 80, 112, 3),
        (6, 5, 2, 112, 192, 4),
        (6, 3, 1, 192, 320, 1),
    ]
    depth_mult = 1.1
    blocks = []
    for expand, k, s, cin, cout, n in base:
        layers = int(math.ceil(n * depth_mult))
        for i in range(layers):
            blocks.append((expand, k, s if i == 0 else 1,
                           cin if i == 0 else cout, cout))
    return blocks  # 23 MBConv blocks


def _fold_bn(key, cout, cp):
    k1, k2, k3, k4 = jax.random.split(key, 4)
    gamma = jax.random.uniform(k1, (cout,), jnp.float32, 0.5, 1.5)
    beta = jax.random.normal(k2, (cout,), jnp.float32) * 0.1
    mean = jax.random.normal(k3, (cout,), jnp.float32) * 0.1
    var = jax.random.uniform(k4, (cout,), jnp.float32, 0.5, 1.5)
    scale = gamma / jnp.sqrt(var + BN_EPS)
    bias = beta - mean * scale
    scale = jnp.pad(scale, (0, cp - cout)).reshape(1, cp)
    bias = jnp.pad(bias, (0, cp - cout)).reshape(1, cp)
    return scale, bias


def _init_conv_bn(key, cin, cout, k):
    # TODO(synk): synthetic folded-BN weights; real checkpoint loading would
    # need the (kh, kw, cin) -> row permutation of torchvision's NCHW weights.
    kw, kbn = jax.random.split(key)
    fan_in = k * k * cin
    kp = _round_up(fan_in, LANE)
    cp = _round_up(cout, LANE)
    w = jax.random.normal(kw, (fan_in, cout), jnp.float32) / math.sqrt(float(fan_in))
    w = jnp.pad(w, ((0, kp - fan_in), (0, cp - cout))).astype(jnp.bfloat16)
    s, b = _fold_bn(kbn, cout, cp)
    return {"w": w, "s": s, "b": b}


def _init_dw_bn(key, c, k):
    kw, kbn = jax.random.split(key)
    cp = _round_up(c, LANE)
    w = jax.random.normal(kw, (k * k, 1, c), jnp.float32) / float(k)
    w = jnp.pad(w, ((0, 0), (0, 0), (0, cp - c)))
    s, b = _fold_bn(kbn, c, cp)
    return {"w": w, "s": s, "b": b}


def _init_se(key, c_exp, c_sq):
    k1, k2, k3, k4 = jax.random.split(key, 4)
    cep = _round_up(c_exp, LANE)
    csp = _round_up(c_sq, LANE)
    w1 = jax.random.normal(k1, (c_exp, c_sq), jnp.float32) / math.sqrt(float(c_exp))
    w2 = jax.random.normal(k3, (c_sq, c_exp), jnp.float32) / math.sqrt(float(c_sq))
    b1 = jax.random.normal(k2, (c_sq,), jnp.float32) * 0.1
    b2 = jax.random.normal(k4, (c_exp,), jnp.float32) * 0.1
    return {
        "w1": jnp.pad(w1, ((0, cep - c_exp), (0, csp - c_sq))).astype(jnp.bfloat16),
        "b1": jnp.pad(b1, (0, csp - c_sq)).reshape(1, csp),
        "w2": jnp.pad(w2, ((0, csp - c_sq), (0, cep - c_exp))).astype(jnp.bfloat16),
        "b2": jnp.pad(b2, (0, cep - c_exp)).reshape(1, cep),
    }


def _init_mbconv(key, expand, k, stride, cin, cout):
    c_exp = cin * expand
    c_sq = max(1, cin // 4)
    keys = jax.random.split(key, 4)
    p = {}
    if expand != 1:
        p["expand"] = _init_conv_bn(keys[0], cin, c_exp, 1)
    p["dw"] = _init_dw_bn(keys[1], c_exp, k)
    p["se"] = _init_se(keys[2], c_exp, c_sq)
    p["project"] = _init_conv_bn(keys[3], c_exp, cout, 1)
    return p


def init_params(key, num_classes):
    cfg = b1_blocks()
    keys = jax.random.split(key, len(cfg) + 3)
    params = {"stem": _init_conv_bn(keys[0], 3, 32, 3)}
    params["blocks"] = [_init_mbconv(keys[1 + i], *c) for i, c in enumerate(cfg)]
    params["head"] = _init_conv_bn(keys[-2], 320, 1280, 1)
    kf1, kf2 = jax.random.split(keys[-1])
    ncp = _round_up(num_classes, LANE)
    fw = jax.random.normal(kf1, (1280, num_classes), jnp.float32) / math.sqrt(1280.0)
    fb = jax.random.normal(kf2, (num_classes,), jnp.float32) * 0.01
    params["fc_w"] = jnp.pad(fw, ((0, 0), (0, ncp - num_classes))).astype(jnp.bfloat16)
    params["fc_b"] = jnp.pad(fb, (0, ncp - num_classes)).reshape(1, ncp)
    params["fc_s"] = jnp.ones((1, ncp), jnp.float32)
    return params, cfg


# ------------------------------ forward pass ---------------------------------

def model_forward(params, cfg, x_nchw, num_classes):
    # NCHW (PyTorch) -> NHWC (kernel layout)
    x = jnp.transpose(x_nchw, (0, 2, 3, 1)).astype(jnp.float32)
    # stem: Conv3x3 s2 + BN + SiLU
    x = conv2d_bn(x, params["stem"], k=3, stride=2, act="silu")
    # 23 MBConv blocks
    for p, c in zip(params["blocks"], cfg):
        x = mbconv_forward(x, p, c)
    # head: Conv1x1 320->1280 + BN + SiLU
    x = conv1x1_bn(x, params["head"], act="silu")
    # adaptive avg pool + flatten -> (N, 1280)
    N, H, W, Cp = x.shape
    feat = pallas_avgpool(x.reshape(N, H * W, Cp))
    # TODO(synk): Dropout(0.15) is identity at inference (eval mode); omitted.
    # fc: Linear(1280, num_classes)
    pred = pallas_matmul(feat, params["fc_w"], params["fc_s"], params["fc_b"],
                         act="none", out_dtype=jnp.float32)
    return pred[:, :num_classes]


if __name__ == "__main__":
    key = jax.random.PRNGKey(0)
    pkey, xkey = jax.random.split(key)
    num_classes = 10
    params, cfg = init_params(pkey, num_classes)
    # EfficientNet expects 3-channel images; small spatial size for the demo.
    x = jax.random.normal(xkey, (2, 3, 16, 16), jnp.float32)  # NCHW like PyTorch
    pred = model_forward(params, cfg, x, num_classes)
    pred = jax.block_until_ready(pred)
    assert pred.shape == (2, num_classes), pred.shape
    assert bool(jnp.all(jnp.isfinite(pred)))
    print("KERNEL_OK")
</pallas_src>

<mosaic_0001>
module attributes {stable_mosaic.version = 11 : i64} {
  func.func @_mm_kernel(%arg0: i32, %arg1: i32, %arg2: i32, %arg3: memref<128x128xbf16, #tpu.memory_space<vmem>>, %arg4: memref<128x128xbf16, #tpu.memory_space<vmem>>, %arg5: memref<1x128xf32, #tpu.memory_space<vmem>>, %arg6: memref<1x128xf32, #tpu.memory_space<vmem>>, %arg7: memref<128x128xbf16, #tpu.memory_space<vmem>>, %arg8: memref<128x128xf32, #tpu.memory_space<vmem>>) attributes {dimension_semantics = [#tpu.dimension_semantics<parallel>, #tpu.dimension_semantics<parallel>, #tpu.dimension_semantics<arbitrary>], iteration_bounds = array<i64: 1, 1, 1>, scalar_prefetch = 0 : i64, scratch_operands = 1 : i64, tpu.core_type = #tpu.core_type<tc>, window_params = [{transform_indices = @transform_0, window_bounds = array<i64: 128, 128>}, {transform_indices = @transform_1, window_bounds = array<i64: 128, 128>}, {transform_indices = @transform_2, window_bounds = array<i64: 1, 128>}, {transform_indices = @transform_3, window_bounds = array<i64: 1, 128>}, {transform_indices = @transform_4, window_bounds = array<i64: 128, 128>}]} {
    %c0_i32 = arith.constant 0 : i32
    %0 = arith.cmpi eq, %arg2, %c0_i32 : i32
    %1 = arith.extui %0 : i1 to i32
    %c0_i32_0 = arith.constant 0 : i32
    %2 = arith.cmpi ne, %1, %c0_i32_0 : i32
    scf.if %2 {
      %cst_10 = arith.constant 0.000000e+00 : f32
      %12 = vector.broadcast %cst_10 : f32 to vector<128x128xf32>
      %c0_11 = arith.constant 0 : index
      %c0_12 = arith.constant 0 : index
      %13 = vector.load %arg8[%c0_11, %c0_12] : memref<128x128xf32, #tpu.memory_space<vmem>>, vector<128x128xf32>
      tpu.vector_store %arg8[%c0_11, %c0_12], %12 {strides = array<i32>} : memref<128x128xf32, #tpu.memory_space<vmem>>, vector<128x128xf32>,
    } else {
    }
    %c0 = arith.constant 0 : index
    %c0_1 = arith.constant 0 : index
    %3 = vector.load %arg8[%c0, %c0_1] : memref<128x128xf32, #tpu.memory_space<vmem>>, vector<128x128xf32>
    %c0_2 = arith.constant 0 : index
    %c0_3 = arith.constant 0 : index
    %4 = vector.load %arg3[%c0_2, %c0_3] : memref<128x128xbf16, #tpu.memory_space<vmem>>, vector<128x128xbf16>
    %c0_4 = arith.constant 0 : index
    %c0_5 = arith.constant 0 : index
    %5 = vector.load %arg4[%c0_4, %c0_5] : memref<128x128xbf16, #tpu.memory_space<vmem>>, vector<128x128xbf16>
    %cst = arith.constant dense<0.000000e+00> : vector<128x128xf32>
    %6 = tpu.matmul %4, %5, %cst {dimension_numbers = #tpu.dot_dimension_numbers<[1], [0], [0], [1], [0, 0, 1, 1], [], []>} : vector<128x128xbf16>, vector<128x128xbf16>, vector<128x128xf32> -> vector<128x128xf32>
    %7 = arith.addf %3, %6 : vector<128x128xf32>
    %c0_6 = arith.constant 0 : index
    %c0_7 = arith.constant 0 : index
    %8 = vector.load %arg8[%c0_6, %c0_7] : memref<128x128xf32, #tpu.memory_space<vmem>>, vector<128x128xf32>
    tpu.vector_store %arg8[%c0_6, %c0_7], %7 {strides = array<i32>} : memref<128x128xf32, #tpu.memory_space<vmem>>, vector<128x128xf32>,
    %c0_i32_8 = arith.constant 0 : i32
    %9 = arith.cmpi eq, %arg2, %c0_i32_8 : i32
    %10 = arith.extui %9 : i1 to i32
    %c0_i32_9 = arith.constant 0 : i32
    %11 = arith.cmpi ne, %10, %c0_i32_9 : i32
    scf.if %11 {
      %c0_10 = arith.constant 0 : index
      %c0_11 = arith.constant 0 : index
      %12 = vector.load %arg8[%c0_10, %c0_11] : memref<128x128xf32, #tpu.memory_space<vmem>>, vector<128x128xf32>
      %c0_12 = arith.constant 0 : index
      %c0_13 = arith.constant 0 : index
      %13 = vector.load %arg5[%c0_12, %c0_13] : memref<1x128xf32, #tpu.memory_space<vmem>>, vector<1x128xf32>
      %14 = vector.broadcast %13 : vector<1x128xf32> to vector<128x128xf32>
      %15 = arith.mulf %12, %14 : vector<128x128xf32>
      %c0_14 = arith.constant 0 : index
      %c0_15 = arith.constant 0 : index
      %16 = vector.load %arg6[%c0_14, %c0_15] : memref<1x128xf32, #tpu.memory_space<vmem>>, vector<1x128xf32>
      %17 = vector.broadcast %16 : vector<1x128xf32> to vector<128x128xf32>
      %18 = arith.addf %15, %17 : vector<128x128xf32>
      %19 = arith.negf %18 : vector<128x128xf32>
      %20 = math.exp %19 : vector<128x128xf32>
      %cst_16 = arith.constant 1.000000e+00 : f32
      %21 = vector.broadcast %cst_16 : f32 to vector<128x128xf32>
      %22 = arith.addf %21, %20 : vector<128x128xf32>
      %23 = arith.divf %21, %22 : vector<128x128xf32>
      %24 = arith.mulf %18, %23 : vector<128x128xf32>
      %25 = arith.truncf %24 : vector<128x128xf32> to vector<128x128xbf16>
      %c0_17 = arith.constant 0 : index
      %c0_18 = arith.constant 0 : index
      %26 = vector.load %arg7[%c0_17, %c0_18] : memref<128x128xbf16, #tpu.memory_space<vmem>>, vector<128x128xbf16>
      tpu.vector_store %arg7[%c0_17, %c0_18], %25 {strides = array<i32>} : memref<128x128xbf16, #tpu.memory_space<vmem>>, vector<128x128xbf16>,
    } else {
    }
    return
  }
  func.func @transform_0(%arg0: i32, %arg1: i32, %arg2: i32) -> (i32, i32) {
    %c0_i32 = arith.constant 0 : i32
    return %arg0, %arg2 : i32, i32
  }
  func.func @transform_1(%arg0: i32, %arg1: i32, %arg2: i32) -> (i32, i32) {
    %c0_i32 = arith.constant 0 : i32
    return %arg2, %arg1 : i32, i32
  }
  func.func @transform_2(%arg0: i32, %arg1: i32, %arg2: i32) -> (i32, i32) {
    %c0_i32 = arith.constant 0 : i32
    %c0_i32_0 = arith.constant 0 : i32
    return %c0_i32, %arg1 : i32, i32
  }
  func.func @transform_3(%arg0: i32, %arg1: i32, %arg2: i32) -> (i32, i32) {
    %c0_i32 = arith.constant 0 : i32
    %c0_i32_0 = arith.constant 0 : i32
    return %c0_i32, %arg1 : i32, i32
  }
  func.func @transform_4(%arg0: i32, %arg1: i32, %arg2: i32) -> (i32, i32) {
    %c0_i32 = arith.constant 0 : i32
    return %arg0, %arg1 : i32, i32
  }
}

</mosaic_0001>

<bundles_post_ra>
// kernel: tpu_custom_call.1
= control target key start
LH: loop header
LB: loop body
LE: loop exit
PB: predicated region body
PF: predicated region fallthrough
CT: control target
= control target key end

     0   :  { %9 = vsyncpa [#allocation4], 0  ;;  %s1491_s0 = inlined_call_operand.hbm [shape: bf16[128,128], index: 0, kind: input, shape index: {}]   ;;  %s1492_s1 = inlined_call_operand.hbm [shape: bf16[128,128], index: 1, kind: input, shape index: {}]   ;;  %s1493_s2 = inlined_call_operand.vmem [shape: f32[1,128], index: 2, kind: input, shape index: {}]   ;;  %s1494_s3 = inlined_call_operand.vmem [shape: f32[1,128], index: 3, kind: input, shape index: {}]   ;;  %s1495_s4 = inlined_call_operand.hbm [shape: bf16[128,128], index: 4, kind: output, shape index: {}]  }
   0x1   :  { %10 = vsyncpa [#allocation7], 0 }
   0x2   :  { %11 = vsyncpa [#allocation5], 0  ;;  %s16_s17 = sshll.u32 %s1491_s0, 4  ;;  %s1042_s18 = smov [#allocation3]   ;;  %s17_s17 = int_to_ptr.hbm [resolvable:$true] %s16_s17 }
   0x3   :  { %s18_s19 = sshll.u32 %s1042_s18, 4  ;;  %s29_s22 = sshll.u32 %s1492_s1, 4  ;;  %s19_s19 = int_to_ptr.vmem [resolvable:$true] %s18_s19  ;;  %s30_s22 = int_to_ptr.hbm [resolvable:$true] %s29_s22 }
   0x4   :  { %s1043_s23 = smov 64   ;;  %s1044_s24 = smov 4  }
   0x5   :  { %24 = dma.hbm_to_vmem [thread:$0]  %s17_s17, 1024, %s19_s19, [#allocation4], %s1043_s23, %s1043_s23, %s1044_s24  }
   0x6   :  { %s1045_s25 = smov [#allocation6]  }
   0x7   :  { %s31_s26 = sshll.u32 %s1045_s25, 4  ;;  %s32_s26 = int_to_ptr.vmem [resolvable:$true] %s31_s26 }
   0x8   :  { %37 = dma.hbm_to_vmem [thread:$0]  %s30_s22, 1024, %s32_s26, [#allocation7], %s1043_s23, %s1043_s23, %s1044_s24  }
   0x9   :  { %1036 = dma.done.wait [#allocation4], 1024  }
   0xa   :  { %1037 = vsyncadd [#allocation4], 4294966272 }
   0xb   :  { %1038 = dma.done.wait [#allocation7], 1024  }
   0xc   :  { %1039 = vsyncadd [#allocation7], 4294966272  ;;  %v821_v0 = vld [vmem:[#allocation6 + $0x38] sm:$0xff]  ;;  %v820_v1 = vld [vmem:[#allocation6 + $0x30] sm:$0xff]  ;;  %s712_s5 = sshll.u32 %s1495_s4, 4  ;;  %s713_s5 = int_to_ptr.hbm [resolvable:$true] %s712_s5 }
   0xd   :  { %214 = vmatpush.bf16.msra.mxu0 %v821_v0  ;;  %869 = vmatpush.bf16.msra.mxu1 %v821_v0  ;;  %v819_v2 = vld [vmem:[#allocation6 + $0x28] sm:$0xff]  ;;  %v818_v3 = vld [vmem:[#allocation6 + $0x20] sm:$0xff]  ;;  %v817_v4 = vld [vmem:[#allocation6 + $0x18] sm:$0xff] }
   0xe   :  { %870 = vmatpush.bf16.msra.mxu2 %v821_v0  ;;  %871 = vmatpush.bf16.msra.mxu3 %v821_v0  ;;  %v816_v5 = vld [vmem:[#allocation6 + $0x10] sm:$0xff]  ;;  %v815_v6 = vld [vmem:[#allocation6 + $0x8] sm:$0xff]  ;;  %v814_v7 = vld [vmem:[#allocation6] sm:$0xff] }
   0xf   :  { %v806_v8 = vld [vmem:[#allocation3] sm:$0xff]  ;;  %v808_v9 = vld [vmem:[#allocation3 + $0x10] sm:$0xff]  ;;  %v807_v12 = vld [vmem:[#allocation3 + $0x8] sm:$0xff] }
  0x10   :  { %v810_v10 = vld [vmem:[#allocation3 + $0x20] sm:$0xff]  ;;  %v812_v11 = vld [vmem:[#allocation3 + $0x30] sm:$0xff]  ;;  %v809_v13 = vld [vmem:[#allocation3 + $0x18] sm:$0xff] }
  0x11   :  { %215 = vmatpush.bf16.msra.mxu0 %v820_v1  ;;  %872 = vmatpush.bf16.msra.mxu1 %v820_v1  ;;  %v811_v14 = vld [vmem:[#allocation3 + $0x28] sm:$0xff]  ;;  %v813_v15 = vld [vmem:[#allocation3 + $0x38] sm:$0xff]  ;;  %v1087_v16 = vld [vmem:[%s1493_s2] ss:$0 sm:$0xff]  ;;  %s1046_s2 = smov [#allocation8]  }
  0x12   :  { %873 = vmatpush.bf16.msra.mxu2 %v820_v1  ;;  %874 = vmatpush.bf16.msra.mxu3 %v820_v1  ;;  %v1092_v17 = vld [vmem:[%s1494_s3] ss:$0 sm:$0xff]  ;;  %s710_s3 = sshll.u32 %s1046_s2, 4  ;;  %s711_s3 = int_to_ptr.vmem [resolvable:$true] %s710_s3 }
  0x15   :  { %216 = vmatpush.bf16.msra.mxu0 %v819_v2  ;;  %875 = vmatpush.bf16.msra.mxu1 %v819_v2 }
  0x16   :  { %876 = vmatpush.bf16.msra.mxu2 %v819_v2  ;;  %877 = vmatpush.bf16.msra.mxu3 %v819_v2 }
  0x19   :  { %217 = vmatpush.bf16.msra.mxu0 %v818_v3  ;;  %878 = vmatpush.bf16.msra.mxu1 %v818_v3 }
  0x1a   :  { %879 = vmatpush.bf16.msra.mxu2 %v818_v3  ;;  %880 = vmatpush.bf16.msra.mxu3 %v818_v3 }
  0x1d   :  { %218 = vmatpush.bf16.msra.mxu0 %v817_v4  ;;  %881 = vmatpush.bf16.msra.mxu1 %v817_v4 }
  0x1e   :  { %882 = vmatpush.bf16.msra.mxu2 %v817_v4  ;;  %883 = vmatpush.bf16.msra.mxu3 %v817_v4 }
  0x21   :  { %219 = vmatpush.bf16.msra.mxu0 %v816_v5  ;;  %884 = vmatpush.bf16.msra.mxu1 %v816_v5 }
  0x22   :  { %885 = vmatpush.bf16.msra.mxu2 %v816_v5  ;;  %886 = vmatpush.bf16.msra.mxu3 %v816_v5 }
  0x25   :  { %220 = vmatpush.bf16.msra.mxu0 %v815_v6  ;;  %887 = vmatpush.bf16.msra.mxu1 %v815_v6 }
  0x26   :  { %888 = vmatpush.bf16.msra.mxu2 %v815_v6  ;;  %889 = vmatpush.bf16.msra.mxu3 %v815_v6 }
  0x29   :  { %221 = vmatpush.bf16.msra.mxu0 %v814_v7  ;;  %890 = vmatpush.bf16.msra.mxu1 %v814_v7 }
  0x2a   :  { %891 = vmatpush.bf16.msra.mxu2 %v814_v7  ;;  %892 = vmatpush.bf16.msra.mxu3 %v814_v7 }
  0x2c   :  { %222 = vmatmul.bf16.vlgmr.msra.gmra.mxu0 %v806_v8  ;;  %232 = vmatmul.bf16.vlgmr.msra.gmra.mxu1 %v808_v9 }
  0x2d   :  { %242 = vmatmul.bf16.vlgmr.msra.gmra.mxu2 %v810_v10  ;;  %252 = vmatmul.bf16.vlgmr.msra.gmra.mxu3 %v812_v11 }
  0x3c   :  { %227 = vmatmul.bf16.gmra.mxu0 %v807_v12  ;;  %237 = vmatmul.bf16.gmra.mxu1 %v809_v13 }
  0x3d   :  { %247 = vmatmul.bf16.gmra.mxu2 %v811_v14  ;;  %257 = vmatmul.bf16.gmra.mxu3 %v813_v15 }
  0xa9   :  { %v223_v18 = vpop.f32.mrf.mxu0  ;;  %v233_v19 = vpop.f32.mrf.mxu1 }
  0xaa   :  { %v318_v20 = vmul.f32 %v1087_v16, %v223_v18  ;;  %v322_v21 = vmul.f32 %v1087_v16, %v233_v19 }
  0xac   :  { %v1097_v22 = vadd.f32 %v1092_v17, %v318_v20  ;;  %v1100_v23 = vadd.f32 %v1092_v17, %v322_v21 }
  0xae   :  { %v790_v24 = vmul.f32 -1.442695, %v1097_v22  ;;  %v794_v25 = vmul.f32 -1.442695, %v1100_v23 }
  0xb0   :  { %900 = vpow2.f32 %v790_v24  ;;  %v243_v26 = vpop.f32.mrf.mxu2  ;;  %v253_v27 = vpop.f32.mrf.mxu3 }
  0xb1   :  { %902 = vpow2.f32 %v794_v25  ;;  %v326_v28 = vmul.f32 %v1087_v16, %v243_v26  ;;  %v330_v29 = vmul.f32 %v1087_v16, %v253_v27  ;;  %v225_v30 = vpop.f32.mrf.mxu0  ;;  %v235_v31 = vpop.f32.mrf.mxu1 }
  0xb2   :  { %v319_v32 = vmul.f32 %v1087_v16, %v225_v30  ;;  %v323_v33 = vmul.f32 %v1087_v16, %v235_v31 }
  0xb3   :  { %v1109_v34 = vadd.f32 %v1092_v17, %v326_v28  ;;  %v1112_v35 = vadd.f32 %v1092_v17, %v330_v29 }
  0xb4   :  { %v1115_v36 = vadd.f32 %v1092_v17, %v319_v32  ;;  %v1118_v37 = vadd.f32 %v1092_v17, %v323_v33 }
  0xb5   :  { %v798_v38 = vmul.f32 -1.442695, %v1109_v34  ;;  %v802_v39 = vmul.f32 -1.442695, %v1112_v35 }
  0xb6   :  { %v901_v40 = vpop.eup %900  ;;  %v791_v43 = vmul.f32 -1.442695, %v1115_v36  ;;  %v795_v45 = vmul.f32 -1.442695, %v1118_v37 }
  0xb7   :  { %v903_v41 = vpop.eup %902  ;;  %v402_v42 = vadd.f32 1.0, %v901_v40  ;;  %904 = vpow2.f32 %v798_v38 }
  0xb8   :  { %v1123_v44 = vadd.f32 1.0, %v903_v41  ;;  %906 = vpow2.f32 %v802_v39  ;;  %v245_v46 = vpop.f32.mrf.mxu2  ;;  %v255_v50 = vpop.f32.mrf.mxu3 }
  0xb9   :  { %908 = vrcp.f32 %v402_v42  ;;  %v327_v47 = vmul.f32 %v1087_v16, %v245_v46  ;;  %v427_v54 = vand.u32 2147483647, %v402_v42  ;;  %v429_v55 = vand.u32 2147483648, %v402_v42  ;;  %v228_v61 = vpop.f32.mrf.mxu0  ;;  %v238_v62 = vpop.f32.mrf.mxu1 }
  0xba   :  { %910 = vrcp.f32 %v1123_v44  ;;  %v487_v59 = vand.u32 2147483647, %v1123_v44  ;;  %v331_v60 = vmul.f32 %v1087_v16, %v255_v50  ;;  %vm423_vm0 = vweird.f32 %v402_v42 }
  0xbb   :  { %912 = vpow2.f32 %v791_v43  ;;  %v1129_v49 = vadd.f32 %v1092_v17, %v327_v47  ;;  %vm483_vm1 = vweird.f32 %v1123_v44  ;;  %v489_v4 = vand.u32 2147483648, %v1123_v44 }
  0xbc   :  { %914 = vpow2.f32 %v795_v45  ;;  %v430_v5 = vor.u32 1.1754944e-38, %v429_v55  ;;  %v320_v7 = vmul.f32 %v1087_v16, %v228_v61  ;;  %v324_v8 = vmul.f32 %v1087_v16, %v238_v62 }
  0xbd   :  { %v905_v48 = vpop.eup %904  ;;  %v799_v1 = vmul.f32 -1.442695, %v1129_v49  ;;  %vm1152_vm2 = vcmp.eq.f32.partialorder %v427_v54, 8.507059e+37  ;;  %vm1156_vm3 = vcmp.eq.f32.partialorder %v487_v59, 8.507059e+37  ;;  %v1165_v14 = vadd.f32 %v1092_v17, %v331_v60 }
  0xbe   :  { %v907_v51 = vpop.eup %906  ;;  %v1131_v52 = vadd.f32 1.0, %v905_v48  ;;  %v490_v25 = vor.u32 1.1754944e-38, %v489_v4  ;;  %v1180_v27 = vadd.f32 %v1092_v17, %v320_v7  ;;  %v1193_v32 = vadd.f32 %v1092_v17, %v324_v8 }
  0xbf   :  { %v1133_v53 = vpop.eup %908  ;;  %v1135_v56 = vadd.f32 1.0, %v907_v51  ;;  %v803_v31 = vmul.f32 -1.442695, %v1165_v14 }
  0xc0   :  { %v1137_v57 = vpop.eup %910  ;;  %v419_v58 = vmul.f32 %v1133_v53, %v402_v42  ;;  %916 = vrcp.f32 %v1131_v52  ;;  %vm424_vm4 = vweird.f32 %v1133_v53  ;;  %v549_v20 = vand.u32 2147483648, %v1131_v52 }
  0xc1   :  { %v913_v63 = vpop.eup %912  ;;  %v479_v0 = vmul.f32 %v1137_v57, %v1123_v44  ;;  %918 = vrcp.f32 %v1135_v56  ;;  %vm484_vm5 = vweird.f32 %v1137_v57  ;;  %v609_v21 = vand.u32 2147483648, %v1135_v56  ;;  %vm1185_vm6 = vmor %vm423_vm0, %vm424_vm4  ;;  %v230_v29 = vpop.f32.mrf.mxu0 }
  0xc2   :  { %v915_v2 = vpop.eup %914  ;;  %v420_v3 = vsub.f32 1.0, %v419_v58  ;;  %v1160_v12 = vadd.f32 1.0, %v913_v63  ;;  %920 = vpow2.f32 %v799_v1  ;;  %v547_v30 = vand.u32 2147483647, %v1131_v52  ;;  %vm1199_vm7 = vmor %vm483_vm1, %vm484_vm5 }
  0xc3   :  { %v480_v6 = vsub.f32 1.0, %v479_v0  ;;  %v1162_v13 = vadd.f32 1.0, %v915_v2  ;;  %vm543_vm8 = vweird.f32 %v1131_v52  ;;  %v607_v40 = vand.u32 2147483647, %v1135_v56 }
  0xc4   :  { %v421_v9 = vmul.f32 %v1133_v53, %v420_v3  ;;  %922 = vrcp.f32 %v1160_v12  ;;  %v550_v43 = vor.u32 1.1754944e-38, %v549_v20  ;;  %v1213_v44 = vor.u32 1.1754944e-38, %v609_v21  ;;  %v248_v3 = vpop.f32.mrf.mxu2  ;;  %v258_v21 = vpop.f32.mrf.mxu3 }
  0xc5   :  { %v481_v15 = vmul.f32 %v1137_v57, %v480_v6  ;;  %924 = vrcp.f32 %v1162_v13  ;;  %vm438_vm10 = vweird.f32 %v1160_v12  ;;  %v442_v47 = vand.u32 2147483647, %v1160_v12 }
  0xc6   :  { %v1170_v18 = vpop.eup %916  ;;  %v422_v19 = vadd.f32 %v1133_v53, %v421_v9  ;;  %vm1219_vm11 = vcmp.eq.f32.partialorder %v547_v30, 8.507059e+37  ;;  %926 = vpow2.f32 %v803_v31  ;;  %v502_v59 = vand.u32 2147483647, %v1162_v13 }
  0xc7   :  { %v482_v24 = vadd.f32 %v1137_v57, %v481_v15  ;;  %v539_v26 = vmul.f32 %v1170_v18, %v1131_v52  ;;  %v1182_v28 = vpop.eup %918  ;;  %vm544_vm9 = vweird.f32 %v1170_v18  ;;  %v504_v62 = vand.u32 2147483648, %v1162_v13 }
  0xc8   :  { %v599_v39 = vmul.f32 %v1182_v28, %v1135_v56  ;;  %v426_v41 = vsel %vm1185_vm6, %v1133_v53, %v422_v19  ;;  %v921_v45 = vpop.eup %920  ;;  %v444_v53 = vand.u32 2147483648, %v1160_v12  ;;  %v792_v63 = vmul.f32 -1.442695, %v1180_v27  ;;  %vm1252_vm15 = vmor %vm543_vm8, %vm544_vm9 }
  0xc9   :  { %v540_v38 = vsub.f32 1.0, %v539_v26  ;;  %v486_v42 = vsel %vm1199_vm7, %v1137_v57, %v482_v24  ;;  %v1224_v54 = vadd.f32 1.0, %v921_v45  ;;  %v431_v55 = vsel %vm1152_vm2, %v430_v5, %v426_v41 }
  0xca   :  { %v923_v48 = vpop.eup %922  ;;  %v600_v51 = vsub.f32 1.0, %v599_v39  ;;  %v491_v57 = vsel %vm1156_vm3, %v490_v25, %v486_v42  ;;  %vm1236_vm12 = vcmp.eq.f32.partialorder %v442_v47, 8.507059e+37  ;;  %vm498_vm13 = vweird.f32 %v1162_v13 }
  0xcb   :  { %v541_v46 = vmul.f32 %v1170_v18, %v540_v38  ;;  %v434_v58 = vmul.f32 %v923_v48, %v1160_v12  ;;  %v925_v60 = vpop.eup %924  ;;  %928 = vrcp.f32 %v1224_v54  ;;  %v658_v4 = vmul.f32 %v431_v55, %v1097_v22 }
  0xcc   :  { %v494_v2 = vmul.f32 %v925_v60, %v1162_v13  ;;  %v601_v5 = vmul.f32 %v1182_v28, %v600_v51  ;;  %vm604_vm14 = vweird.f32 %v1182_v28  ;;  %v445_v6 = vor.u32 1.1754944e-38, %v444_v53  ;;  %v927_v10 = vpop.eup %926 }
  0xcd   :  { %v542_v61 = vadd.f32 %v1170_v18, %v541_v46  ;;  %v435_v0 = vsub.f32 1.0, %v434_v58  ;;  %v1246_v7 = vmul.f32 %v491_v57, %v1100_v23  ;;  %vm603_vm0 = vweird.f32 %v1135_v56  ;;  %v250_v57 = vpop.f32.mrf.mxu2 }
  0xce   :  { %vm439_vm1 = vweird.f32 %v923_v48  ;;  %v495_v22 = vsub.f32 1.0, %v494_v2  ;;  %vm1260_vm2 = vcmp.eq.f32.partialorder %v502_v59, 8.507059e+37  ;;  %v505_v15 = vor.u32 1.1754944e-38, %v504_v62  ;;  %vm1299_vm8 = vmor %vm603_vm0, %vm604_vm14 }
  0xcf   :  { %v436_v9 = vmul.f32 %v923_v48, %v435_v0  ;;  %v546_v11 = vsel %vm1252_vm15, %v1170_v18, %v542_v61  ;;  %930 = vpow2.f32 %v792_v63  ;;  %vm499_vm3 = vweird.f32 %v925_v60  ;;  %vm440_vm4 = vmor %vm438_vm10, %vm439_vm1 }
  0xd0   :  { %v496_v19 = vmul.f32 %v925_v60, %v495_v22  ;;  %v1264_v20 = vadd.f32 1.0, %v927_v10  ;;  %v1267_v25 = vadd.f32 %v1182_v28, %v601_v5  ;;  %vm558_vm5 = vweird.f32 %v1224_v54  ;;  %vm500_vm6 = vmor %vm498_vm13, %vm499_vm3  ;;  %v260_v22 = vpop.f32.mrf.mxu3 }
  0xd1   :  { %v437_v52 = vadd.f32 %v923_v48, %v436_v9  ;;  %v929_v24 = vpop.eup %928  ;;  %v796_v18 = vmul.f32 -1.442695, %v1193_v32  ;;  %v328_v26 = vmul.f32 %v1087_v16, %v248_v3  ;;  %v551_v30 = vsel %vm1219_vm11, %v550_v43, %v546_v11 }
  0xd2   :  { %v497_v33 = vadd.f32 %v925_v60, %v496_v19  ;;  %v554_v38 = vmul.f32 %v929_v24, %v1224_v54  ;;  %v562_v12 = vand.u32 2147483647, %v1224_v54  ;;  %932 = vrcp.f32 %v1264_v20 }
  0xd3   :  { %v441_v31 = vsel %vm440_vm4, %v923_v48, %v437_v52  ;;  %v332_v41 = vmul.f32 %v1087_v16, %v258_v21  ;;  %v321_v46 = vmul.f32 %v1087_v16, %v230_v29  ;;  %v564_v50 = vand.u32 2147483648, %v1224_v54 }
  0xd4   :  { %v446_v39 = vsel %vm1236_vm12, %v445_v6, %v441_v31  ;;  %v501_v43 = vsel %vm500_vm6, %v925_v60, %v497_v33  ;;  %v555_v45 = vsub.f32 1.0, %v554_v38  ;;  %934 = vpow2.f32 %v796_v18 }
  0xd5   :  { %v659_v42 = vmul.f32 %v446_v39, %v1115_v36  ;;  %v931_v47 = vpop.eup %930  ;;  %v506_v48 = vsel %vm1260_vm2, %v505_v15, %v501_v43  ;;  %v1291_v13 = vadd.f32 %v1092_v17, %v328_v26  ;;  %vm559_vm7 = vweird.f32 %v929_v24  ;;  %v240_v36 = vpop.f32.mrf.mxu1 }
  0xd6   :  { %v663_v53 = vmul.f32 %v506_v48, %v1118_v37  ;;  %v556_v55 = vmul.f32 %v929_v24, %v555_v45  ;;  %v666_v58 = vmul.f32 %v551_v30, %v1109_v34  ;;  %v1303_v60 = vadd.f32 1.0, %v931_v47  ;;  %vm560_vm9 = vmor %vm558_vm5, %vm559_vm7 }
  0xd7   :  { %v825_v51 = vpack.c.bf16 %v659_v42, %v658_v4  ;;  %v800_v61 = vmul.f32 -1.442695, %v1291_v13  ;;  %v1307_v37 = vadd.f32 %v1092_v17, %v332_v41  ;;  %v606_v34 = vsel %vm1299_vm8, %v1182_v28, %v1267_v25 }
  0xd8   :  { %v835_v62 = vpack.c.bf16 %v663_v53, %v1246_v7  ;;  %v557_v63 = vadd.f32 %v929_v24, %v556_v55  ;;  %v1315_v0 = vadd.f32 %v1092_v17, %v321_v46  ;;  %v933_v1 = vpop.eup %932  ;;  %v565_v2 = vor.u32 1.1754944e-38, %v564_v50 }
  0xd9   :  { %826 = vst [vmem:[#allocation8] sm:$0xff] %v825_v51   ;;  %936 = vrcp.f32 %v1303_v60  ;;  %v325_v3 = vmul.f32 %v1087_v16, %v240_v36  ;;  %v329_v4 = vmul.f32 %v1087_v16, %v250_v57  ;;  %vm563_vm10 = vcmp.eq.f32.partialorder %v562_v12, 8.507059e+37 }
  0xda   :  { %863 = vst [vmem:[#allocation8 + $0x10] sm:$0xff] %v835_v62   ;;  %v561_v28 = vsel %vm560_vm9, %v929_v24, %v557_v63  ;;  %v614_v5 = vmul.f32 %v933_v1, %v1264_v20  ;;  %938 = vpow2.f32 %v800_v61  ;;  %v935_v6 = vpop.eup %934  ;;  %v622_v8 = vand.u32 2147483647, %v1264_v20 }
  0xdb   :  { %v566_v7 = vsel %vm563_vm10, %v565_v2, %v561_v28  ;;  %v624_v54 = vand.u32 2147483648, %v1264_v20  ;;  %v804_v9 = vmul.f32 -1.442695, %v1307_v37  ;;  %v1327_v23 = vadd.f32 1.0, %v935_v6 }
  0xdc   :  { %v667_v10 = vmul.f32 %v566_v7, %v1129_v49  ;;  %v615_v11 = vsub.f32 1.0, %v614_v5  ;;  %v793_v15 = vmul.f32 -1.442695, %v1315_v0  ;;  %vm619_vm11 = vweird.f32 %v933_v1 }
  0xdd   :  { %940 = vpow2.f32 %v804_v9  ;;  %v1331_v52 = vadd.f32 %v1092_v17, %v325_v3  ;;  %v1334_v19 = vadd.f32 %v1092_v17, %v329_v4  ;;  %v333_v25 = vmul.f32 %v1087_v16, %v260_v22 }
  0xde   :  { %v845_v21 = vpack.c.bf16 %v667_v10, %v666_v58  ;;  %v616_v24 = vmul.f32 %v933_v1, %v615_v11  ;;  %942 = vrcp.f32 %v1327_v23  ;;  %vm608_vm12 = vcmp.eq.f32.partialorder %v607_v40, 8.507059e+37 }
  0xdf   :  { %v1338_v49 = vpop.eup %936  ;;  %944 = vpow2.f32 %v793_v15  ;;  %v797_v18 = vmul.f32 -1.442695, %v1331_v52  ;;  %v611_v29 = vsel %vm608_vm12, %v1213_v44, %v606_v34  ;;  %vm618_vm13 = vweird.f32 %v1264_v20 }
  0xe0   :  { %v939_v26 = vpop.eup %938  ;;  %865 = vst [vmem:[#allocation8 + $0x20] sm:$0xff] %v845_v21   ;;  %v617_v30 = vadd.f32 %v933_v1, %v616_v24  ;;  %v449_v31 = vmul.f32 %v1338_v49, %v1303_v60  ;;  %vm620_vm14 = vmor %vm618_vm13, %vm619_vm11  ;;  %v625_v16 = vor.u32 1.1754944e-38, %v624_v54  ;;  %v801_v56 = vmul.f32 -1.442695, %v1334_v19 }
  0xe1   :  { %v1348_v33 = vadd.f32 1.0, %v939_v26  ;;  %946 = vpow2.f32 %v797_v18  ;;  %vm623_vm15 = vcmp.eq.f32.partialorder %v622_v8, 8.507059e+37  ;;  %v1352_v44 = vadd.f32 %v1092_v17, %v333_v25 }
  0xe2   :  { %v621_v40 = vsel %vm620_vm14, %v933_v1, %v617_v30  ;;  %v450_v38 = vsub.f32 1.0, %v449_v31  ;;  %v670_v41 = vmul.f32 %v611_v29, %v1112_v35  ;;  %vm453_vm0 = vweird.f32 %v1303_v60 }
  0xe3   :  { %v941_v39 = vpop.eup %940  ;;  %v626_v12 = vsel %vm623_vm15, %v625_v16, %v621_v40  ;;  %948 = vrcp.f32 %v1348_v33  ;;  %v805_v17 = vmul.f32 -1.442695, %v1352_v44  ;;  %vm454_vm1 = vweird.f32 %v1338_v49 }
  0xe4   :  { %v1355_v20 = vpop.eup %942  ;;  %v671_v42 = vmul.f32 %v626_v12, %v1165_v14  ;;  %v451_v43 = vmul.f32 %v1338_v49, %v450_v38  ;;  %v1360_v45 = vadd.f32 1.0, %v941_v39  ;;  %950 = vpow2.f32 %v801_v56  ;;  %vm455_vm2 = vmor %vm453_vm0, %vm454_vm1 }
  0xe5   :  { %v945_v46 = vpop.eup %944  ;;  %v509_v47 = vmul.f32 %v1355_v20, %v1327_v23  ;;  %v459_v36 = vand.u32 2147483648, %v1303_v60  ;;  %v457_v57 = vand.u32 2147483647, %v1303_v60  ;;  %v517_v63 = vand.u32 2147483647, %v1327_v23 }
  0xe6   :  { %v855_v48 = vpack.c.bf16 %v671_v42, %v670_v41  ;;  %952 = vrcp.f32 %v1360_v45  ;;  %v452_v14 = vadd.f32 %v1338_v49, %v451_v43  ;;  %v1369_v51 = vadd.f32 1.0, %v945_v46 }
  0xe7   :  { %v947_v50 = vpop.eup %946  ;;  %v510_v35 = vsub.f32 1.0, %v509_v47  ;;  %954 = vpow2.f32 %v805_v17  ;;  %v519_v1 = vand.u32 2147483648, %v1327_v23  ;;  %v460_v60 = vor.u32 1.1754944e-38, %v459_v36 }
  0xe8   :  { %867 = vst [vmem:[#allocation8 + $0x30] sm:$0xff] %v855_v48   ;;  %v1371_v53 = vadd.f32 1.0, %v947_v50  ;;  %956 = vrcp.f32 %v1369_v51  ;;  %v456_v62 = vsel %vm455_vm2, %v1338_v49, %v452_v14  ;;  %v579_v2 = vand.u32 2147483648, %v1348_v33 }
  0xe9   :  { %v1373_v55 = vpop.eup %948  ;;  %v511_v61 = vmul.f32 %v1355_v20, %v510_v35  ;;  %vm458_vm3 = vcmp.eq.f32.partialorder %v457_v57, 8.507059e+37  ;;  %vm513_vm4 = vweird.f32 %v1327_v23  ;;  %vm514_vm5 = vweird.f32 %v1355_v20 }
  0xea   :  { %v569_v58 = vmul.f32 %v1373_v55, %v1348_v33  ;;  %v951_v59 = vpop.eup %950  ;;  %958 = vrcp.f32 %v1371_v53  ;;  %v461_v28 = vsel %vm458_vm3, %v460_v60, %v456_v62  ;;  %vm1395_vm6 = vcmp.eq.f32.partialorder %v517_v63, 8.507059e+37  ;;  %vm1411_vm8 = vmor %vm513_vm4, %vm514_vm5 }
  0xeb   :  { %v512_v5 = vadd.f32 %v1355_v20, %v511_v61  ;;  %v1393_v7 = vadd.f32 1.0, %v951_v59  ;;  %v520_v9 = vor.u32 1.1754944e-38, %v519_v1  ;;  %vm573_vm7 = vweird.f32 %v1348_v33 }
  0xec   :  { %v1381_v34 = vpop.eup %952  ;;  %v570_v4 = vsub.f32 1.0, %v569_v58  ;;  %v577_v22 = vand.u32 2147483647, %v1348_v33  ;;  %v580_v10 = vor.u32 1.1754944e-38, %v579_v2  ;;  %v1405_v24 = vmul.f32 %v461_v28, %v1180_v27 }
  0xed   :  { %v955_v3 = vpop.eup %954  ;;  %v629_v6 = vmul.f32 %v1381_v34, %v1360_v45  ;;  %v639_v18 = vand.u32 2147483648, %v1360_v45  ;;  %960 = vrcp.f32 %v1393_v7  ;;  %v516_v26 = vsel %vm1411_vm8, %v1355_v20, %v512_v5 }
  0xee   :  { %v957_v8 = vpop.eup %956  ;;  %v1402_v15 = vadd.f32 1.0, %v955_v3  ;;  %v571_v49 = vmul.f32 %v1373_v55, %v570_v4  ;;  %vm574_vm9 = vweird.f32 %v1373_v55  ;;  %v472_v23 = vand.u32 2147483647, %v1369_v51 }
  0xef   :  { %v464_v11 = vmul.f32 %v957_v8, %v1369_v51  ;;  %v630_v27 = vsub.f32 1.0, %v629_v6  ;;  %v474_v31 = vand.u32 2147483648, %v1369_v51  ;;  %v532_v16 = vand.u32 2147483647, %v1371_v53  ;;  %vm1444_vm3 = vmor %vm573_vm7, %vm574_vm9 }
  0xf0   :  { %v959_v21 = vpop.eup %958  ;;  %vm1426_vm10 = vcmp.eq.f32.partialorder %v577_v22, 8.507059e+37  ;;  %vm633_vm11 = vweird.f32 %v1360_v45  ;;  %vm469_vm12 = vweird.f32 %v957_v8  ;;  %962 = vrcp.f32 %v1402_v15 }
  0xf1   :  { %v465_v29 = vsub.f32 1.0, %v464_v11  ;;  %v524_v30 = vmul.f32 %v959_v21, %v1371_v53  ;;  %v521_v39 = vsel %vm1395_vm6, %v520_v9, %v516_v26  ;;  %v572_v12 = vadd.f32 %v1373_v55, %v571_v49 }
  0xf2   :  { %vm468_vm13 = vweird.f32 %v1369_v51  ;;  %v534_v20 = vand.u32 2147483648, %v1371_v53  ;;  %v631_v41 = vmul.f32 %v1381_v34, %v630_v27  ;;  %vm529_vm14 = vweird.f32 %v959_v21 }
  0xf3   :  { %v466_v40 = vmul.f32 %v957_v8, %v465_v29  ;;  %v525_v38 = vsub.f32 1.0, %v524_v30  ;;  %v961_v46 = vpop.eup %960  ;;  %vm634_vm15 = vweird.f32 %v1381_v34  ;;  %vm470_vm0 = vmor %vm468_vm13, %vm469_vm12  ;;  %vm473_vm1 = vcmp.eq.f32.partialorder %v472_v23, 8.507059e+37 }
  0xf4   :  { %v475_v47 = vor.u32 1.1754944e-38, %v474_v31  ;;  %vm528_vm2 = vweird.f32 %v1371_v53  ;;  %vm533_vm4 = vcmp.eq.f32.partialorder %v532_v16, 8.507059e+37  ;;  %v584_v35 = vmul.f32 %v961_v46, %v1393_v7  ;;  %vm1467_vm7 = vmor %vm633_vm11, %vm634_vm15 }
  0xf5   :  { %v467_v42 = vadd.f32 %v957_v8, %v466_v40  ;;  %v526_v43 = vmul.f32 %v959_v21, %v525_v38  ;;  %v664_v14 = vmul.f32 %v521_v39, %v1193_v32  ;;  %v576_v51 = vsel %vm1444_vm3, %v1373_v55, %v572_v12  ;;  %vm530_vm5 = vmor %vm528_vm2, %vm529_vm14 }
  0xf6   :  { %v535_v36 = vor.u32 1.1754944e-38, %v534_v20  ;;  %v963_v33 = vpop.eup %962  ;;  %v632_v57 = vadd.f32 %v1381_v34, %v631_v41  ;;  %v585_v61 = vsub.f32 1.0, %v584_v35  ;;  %v592_v63 = vand.u32 2147483647, %v1393_v7 }
  0xf7   :  { %v471_v48 = vsel %vm470_vm0, %v957_v8, %v467_v42  ;;  %v527_v50 = vadd.f32 %v959_v21, %v526_v43  ;;  %v594_v32 = vand.u32 2147483648, %v1393_v7  ;;  %v644_v1 = vmul.f32 %v963_v33, %v1402_v15 }
  0xf8   :  { %v476_v53 = vsel %vm473_vm1, %v475_v47, %v471_v48  ;;  %v586_v2 = vmul.f32 %v961_v46, %v585_v61  ;;  %vm589_vm6 = vweird.f32 %v961_v46  ;;  %v581_v3 = vsel %vm1426_vm10, %v580_v10, %v576_v51 }
  0xf9   :  { %v661_v58 = vmul.f32 %v476_v53, %v1315_v0  ;;  %v531_v59 = vsel %vm530_vm5, %v959_v21, %v527_v50  ;;  %v637_v4 = vand.u32 2147483647, %v1360_v45  ;;  %vm588_vm8 = vweird.f32 %v1393_v7 }
  0xfa   :  { %v536_v62 = vsel %vm533_vm4, %v535_v36, %v531_v59  ;;  %v645_v28 = vsub.f32 1.0, %v644_v1  ;;  %v587_v6 = vadd.f32 %v961_v46, %v586_v2  ;;  %v654_v8 = vand.u32 2147483648, %v1402_v15  ;;  %vm590_vm9 = vmor %vm588_vm8, %vm589_vm6 }
  0xfb   :  { %v830_v55 = vpack.c.bf16 %v661_v58, %v1405_v24  ;;  %v665_v60 = vmul.f32 %v536_v62, %v1331_v52  ;;  %v636_v52 = vsel %vm1467_vm7, %v1381_v34, %v632_v57  ;;  %v595_v54 = vor.u32 1.1754944e-38, %v594_v32 }
  0xfc   :  { %v646_v9 = vmul.f32 %v963_v33, %v645_v28  ;;  %vm649_vm10 = vweird.f32 %v963_v33  ;;  %v652_v22 = vand.u32 2147483647, %v1402_v15  ;;  %v640_v10 = vor.u32 1.1754944e-38, %v639_v18 }
  0xfd   :  { %862 = vst [vmem:[#allocation8 + $0x8] sm:$0xff] %v830_v55   ;;  %v840_v5 = vpack.c.bf16 %v665_v60, %v664_v14  ;;  %v591_v7 = vsel %vm590_vm9, %v961_v46, %v587_v6  ;;  %vm593_vm11 = vcmp.eq.f32.partialorder %v592_v63, 8.507059e+37  ;;  %vm638_vm12 = vcmp.eq.f32.partialorder %v637_v4, 8.507059e+37 }
  0xfe   :  { %v596_v11 = vsel %vm593_vm11, %v595_v54, %v591_v7  ;;  %v647_v34 = vadd.f32 %v963_v33, %v646_v9  ;;  %vm648_vm13 = vweird.f32 %v1402_v15  ;;  %v668_v21 = vmul.f32 %v581_v3, %v1291_v13 }
  0xff   :  { %864 = vst [vmem:[#allocation8 + $0x18] sm:$0xff] %v840_v5   ;;  %v641_v24 = vsel %vm638_vm12, %v640_v10, %v636_v52  ;;  %v669_v25 = vmul.f32 %v596_v11, %v1334_v19  ;;  %vm650_vm14 = vmor %vm648_vm13, %vm649_vm10  ;;  %v655_v49 = vor.u32 1.1754944e-38, %v654_v8  ;;  %vm653_vm15 = vcmp.eq.f32.partialorder %v652_v22, 8.507059e+37 }
 0x100   :  { %v651_v26 = vsel %vm650_vm14, %v963_v33, %v647_v34  ;;  %v672_v18 = vmul.f32 %v641_v24, %v1307_v37 }
 0x101   :  { %v850_v27 = vpack.c.bf16 %v669_v25, %v668_v21  ;;  %v656_v45 = vsel %vm653_vm15, %v655_v49, %v651_v26 }
 0x102   :  { %v673_v15 = vmul.f32 %v656_v45, %v1352_v44 }
 0x103   :  { %866 = vst [vmem:[#allocation8 + $0x28] sm:$0xff] %v850_v27  }
 0x104   :  { %v860_v13 = vpack.c.bf16 %v673_v15, %v672_v18 }
 0x106   :  { %868 = vst [vmem:[#allocation8 + $0x38] sm:$0xff] %v860_v13  }
 0x107   :  { %718 = dma.vmem_to_hbm [thread:$0]  %s711_s3, 1024, %s713_s5, [#allocation5], %s1043_s23, %s1043_s23, %s1044_s24  }
 0x108   :  { %1040 = dma.done.wait [#allocation5], 1024  }
 0x109   :  { %1041 = vsyncadd [#allocation5], 4294966272 }
 0x10a   :  { %723 = vsyncpa [#allocation4], 1 }
 0x10b   :  { %724 = vsyncpa [#allocation7], 1 }
 0x10c   :  { %725 = vsyncpa [#allocation5], 1 }

</bundles_post_ra>
